<compile_context>
chip_gen: v7x
topology: tpu7x:2x2x1
jax: 0.10.0
libtpu: 0.0.40
codegen_flags: <defaults>
</compile_context>

<pallas_src>
import functools

import jax
import jax.numpy as jnp
from jax.experimental import pallas as pl
from jax.experimental.pallas import tpu as pltpu

_NEG_LARGE = -1e30  # finite "-inf" used to mask padded logit lanes


def _round_up(n, m):
    return ((n + m - 1) // m) * m


def _rnn_seq_kernel(x_ref, h0_ref, w_ref, b_ref, out_ref, hid_ref, comb_ref,
                    *, H, O, Ip, Hp):
    """One grid step == one RNN timestep.

    x_ref:    (1, Bp, Ip)  this step's input, zero-padded to 128 lanes
    h0_ref:   (Bp, Hp)     initial hidden (read only at t == 0)
    w_ref:    (Ip+Hp, Np)  fused [i2h | i2o] weights (zero-padded rows/lanes)
    b_ref:    (1, Np)      fused [b_i2h | b_i2o] biases
    out_ref:  (1, Bp, Np)  per-step log-softmax (valid lanes [H, H+O))
    hid_ref:  (Bp, Hp)     final hidden (resident block, rewritten each step)
    comb_ref: (Bp, Ip+Hp)  VMEM scratch carrying [x | hidden] across steps
    """
    t = pl.program_id(0)

    # Seed the hidden half of the combined buffer once.
    @pl.when(t == 0)
    def _():
        comb_ref[:, Ip:Ip + Hp] = h0_ref[...]

    # Refresh the input half with this timestep's (already zero-padded) x.
    comb_ref[:, :Ip] = x_ref[0]

    # Single fused lane-dense MXU pass: lanes [0:H) -> hidden, [H:H+O) -> logits.
    acc = jnp.dot(comb_ref[...], w_ref[...],
                  preferred_element_type=jnp.float32,
                  precision=jax.lax.Precision.HIGHEST)
    acc = acc + b_ref[...]

    lane = jax.lax.broadcasted_iota(jnp.int32, acc.shape, 1)

    # New hidden: keep lanes [0:H), zero the rest, carry it in VMEM for the
    # next step and into the (resident) hidden output block.
    hid_full = jnp.where(lane < H, acc, 0.0)
    comb_ref[:, Ip:Ip + Hp] = hid_full[:, :Hp]
    hid_ref[...] = hid_full[:, :Hp]

    # Numerically stable log-softmax over the O logit lanes (EUP/XLU path);
    # padded lanes are masked to a large negative value before max/sum.
    logits = jnp.where(jnp.logical_and(lane >= H, lane < H + O), acc, _NEG_LARGE)
    m = jnp.max(logits, axis=1, keepdims=True)
    shifted = logits - m
    lse = jnp.log(jnp.sum(jnp.exp(shifted), axis=1, keepdims=True))
    out_ref[0] = shifted - lse


@jax.jit
def rnnet_forward_seq(xs, h0, params):
    """Run T Elman steps in a single pallas_call.

    xs: (T, B, input_size), h0: (B, hidden_size)
    returns: (log_softmax outputs (T, B, O), final hidden (B, H))
    """
    T, B, I = xs.shape
    H = params["w_i2h"].shape[0]
    O = params["w_i2o"].shape[0]

    Bp = _round_up(B, 8)
    Ip = _round_up(I, 128)
    Hp = _round_up(H, 128)
    Np = _round_up(H + O, 128)
    Kp = Ip + Hp
    f32 = jnp.float32

    # Pack both Linears into one lane-dense weight slab (once per call,
    # amortized over all T steps; folded by jit).
    w_i2h_t = params["w_i2h"].T.astype(f32)   # (I+H, H)
    w_i2o_t = params["w_i2o"].T.astype(f32)   # (I+H, O)
    w_all = jnp.zeros((Kp, Np), f32)
    w_all = w_all.at[:I, :H].set(w_i2h_t[:I])
    w_all = w_all.at[:I, H:H + O].set(w_i2o_t[:I])
    w_all = w_all.at[Ip:Ip + H, :H].set(w_i2h_t[I:])
    w_all = w_all.at[Ip:Ip + H, H:H + O].set(w_i2o_t[I:])

    b_all = jnp.zeros((1, Np), f32)
    b_all = b_all.at[0, :H].set(params["b_i2h"].astype(f32))
    b_all = b_all.at[0, H:H + O].set(params["b_i2o"].astype(f32))

    x_pad = jnp.zeros((T, Bp, Ip), f32).at[:, :B, :I].set(xs.astype(f32))
    h0_pad = jnp.zeros((Bp, Hp), f32).at[:B, :H].set(h0.astype(f32))

    kernel = functools.partial(_rnn_seq_kernel, H=H, O=O, Ip=Ip, Hp=Hp)

    out_pad, hid_pad = pl.pallas_call(
        kernel,
        grid=(T,),
        in_specs=[
            pl.BlockSpec((1, Bp, Ip), lambda t: (t, 0, 0)),   # x: one step per grid point
            pl.BlockSpec((Bp, Hp), lambda t: (0, 0)),         # h0: pinned in VMEM
            pl.BlockSpec((Kp, Np), lambda t: (0, 0)),         # fused weights: pinned
            pl.BlockSpec((1, Np), lambda t: (0, 0)),          # fused biases: pinned
        ],
        out_specs=(
            pl.BlockSpec((1, Bp, Np), lambda t: (t, 0, 0)),   # per-step log-softmax (lane-dense)
            pl.BlockSpec((Bp, Hp), lambda t: (0, 0)),         # final hidden (resident block)
        ),
        out_shape=(
            jax.ShapeDtypeStruct((T, Bp, Np), f32),
            jax.ShapeDtypeStruct((Bp, Hp), f32),
        ),
        scratch_shapes=[pltpu.VMEM((Bp, Kp), f32)],           # [x | hidden] carry buffer
        input_output_aliases={1: 1},                          # h0 buffer -> final hidden
        compiler_params=pltpu.CompilerParams(
            dimension_semantics=("arbitrary",)),              # sequential time dependence
    )(x_pad, h0_pad, w_all, b_all)

    return out_pad[:, :B, H:H + O], hid_pad[:B, :H]


def rnnet_forward(x, hidden, params):
    """Single-step interface matching RNNet.forward(input, hidden)."""
    outputs, new_hidden = rnnet_forward_seq(x[None], hidden, params)
    return outputs[0], new_hidden


def init_params(key, input_size, hidden_size, output_size):
    """Deterministic init mirroring nn.Linear's U(-1/sqrt(fan_in), 1/sqrt(fan_in))."""
    k1, k2, k3, k4 = jax.random.split(key, 4)
    fan_in = input_size + hidden_size
    bound = 1.0 / jnp.sqrt(jnp.float32(fan_in))
    return {
        "w_i2h": jax.random.uniform(k1, (hidden_size, fan_in), jnp.float32,
                                    -bound, bound),
        "b_i2h": jax.random.uniform(k2, (hidden_size,), jnp.float32,
                                    -bound, bound),
        "w_i2o": jax.random.uniform(k3, (output_size, fan_in), jnp.float32,
                                    -bound, bound),
        "b_i2o": jax.random.uniform(k4, (output_size,), jnp.float32,
                                    -bound, bound),
    }


def _ref_step(x, h, params):
    """Plain-JAX reference of RNNet.forward (no Pallas)."""
    combined = jnp.concatenate([x, h], axis=1)
    hid = jnp.dot(combined, params["w_i2h"].T,
                  precision=jax.lax.Precision.HIGHEST) + params["b_i2h"]
    logits = jnp.dot(combined, params["w_i2o"].T,
                     precision=jax.lax.Precision.HIGHEST) + params["b_i2o"]
    return jax.nn.log_softmax(logits, axis=1), hid


if __name__ == "__main__":
    input_size, hidden_size, output_size = 16, 32, 10
    batch, seq_len = 2, 8

    key = jax.random.PRNGKey(0)
    kp, kx, kxs = jax.random.split(key, 3)
    params = init_params(kp, input_size, hidden_size, output_size)

    # --- single step (exactly RNNet.forward) ---------------------------------
    x = jax.random.normal(kx, (batch, input_size), jnp.float32)
    h0 = jnp.zeros((batch, hidden_size), jnp.float32)   # like initHidden()

    output, new_hidden = rnnet_forward(x, h0, params)
    jax.block_until_ready((output, new_hidden))

    ref_out, ref_hidden = _ref_step(x, h0, params)
    assert jnp.allclose(output, ref_out, atol=1e-5), "single-step output mismatch"
    assert jnp.allclose(new_hidden, ref_hidden, atol=1e-5), "single-step hidden mismatch"

    # --- whole sequence in ONE kernel launch (hidden never leaves VMEM) ------
    xs = jax.random.normal(kxs, (seq_len, batch, input_size), jnp.float32)
    outs, h_final = rnnet_forward_seq(xs, h0, params)
    jax.block_until_ready((outs, h_final))

    h = h0
    ref_outs = []
    for t in range(seq_len):
        o, h = _ref_step(xs[t], h, params)
        ref_outs.append(o)
    ref_outs = jnp.stack(ref_outs)

    assert jnp.allclose(outs, ref_outs, atol=1e-4), "sequence output mismatch"
    assert jnp.allclose(h_final, h, atol=1e-4), "sequence hidden mismatch"

    print("KERNEL_OK")
</pallas_src>

<mosaic_0001>
module attributes {stable_mosaic.version = 11 : i64} {
  func.func @_rnn_seq_kernel(%arg0: i32, %arg1: memref<1x8x128xf32, #tpu.memory_space<vmem>>, %arg2: memref<8x128xf32, #tpu.memory_space<vmem>>, %arg3: memref<256x128xf32, #tpu.memory_space<vmem>>, %arg4: memref<1x128xf32, #tpu.memory_space<vmem>>, %arg5: memref<1x8x128xf32, #tpu.memory_space<vmem>>, %arg6: memref<8x128xf32, #tpu.memory_space<vmem>>, %arg7: memref<8x256xf32, #tpu.memory_space<vmem>>) attributes {dimension_semantics = [#tpu.dimension_semantics<arbitrary>], iteration_bounds = array<i64: 1>, scalar_prefetch = 0 : i64, scratch_operands = 1 : i64, tpu.core_type = #tpu.core_type<tc>, window_params = [{transform_indices = @transform_0, window_bounds = array<i64: 1, 8, 128>}, {pipeline_mode = #tpu.pipeline_mode<synchronous>, transform_indices = @transform_1, window_bounds = array<i64: 8, 128>}, {pipeline_mode = #tpu.pipeline_mode<synchronous>, transform_indices = @transform_2, window_bounds = array<i64: 256, 128>}, {pipeline_mode = #tpu.pipeline_mode<synchronous>, transform_indices = @transform_3, window_bounds = array<i64: 1, 128>}, {transform_indices = @transform_4, window_bounds = array<i64: 1, 8, 128>}, {pipeline_mode = #tpu.pipeline_mode<synchronous>, transform_indices = @transform_5, window_bounds = array<i64: 8, 128>}]} {
    %c0_i32 = arith.constant 0 : i32
    %0 = arith.cmpi eq, %arg0, %c0_i32 : i32
    %1 = arith.extui %0 : i1 to i32
    %c0_i32_0 = arith.constant 0 : i32
    %2 = arith.cmpi ne, %1, %c0_i32_0 : i32
    scf.if %2 {
      %c0_22 = arith.constant 0 : index
      %c0_23 = arith.constant 0 : index
      %39 = vector.load %arg2[%c0_22, %c0_23] : memref<8x128xf32, #tpu.memory_space<vmem>>, vector<8x128xf32>
      %c0_24 = arith.constant 0 : index
      %c128_25 = arith.constant 128 : index
      %40 = vector.load %arg7[%c0_24, %c128_25] : memref<8x256xf32, #tpu.memory_space<vmem>>, vector<8x128xf32>
      tpu.vector_store %arg7[%c0_24, %c128_25], %39 {strides = array<i32>} : memref<8x256xf32, #tpu.memory_space<vmem>>, vector<8x128xf32>,
    } else {
    }
    %c0 = arith.constant 0 : index
    %c0_1 = arith.constant 0 : index
    %c0_2 = arith.constant 0 : index
    %3 = vector.load %arg1[%c0, %c0_1, %c0_2] : memref<1x8x128xf32, #tpu.memory_space<vmem>>, vector<1x8x128xf32>
    %4 = vector.shape_cast %3 : vector<1x8x128xf32> to vector<8x128xf32>
    %c0_3 = arith.constant 0 : index
    %c0_4 = arith.constant 0 : index
    %5 = vector.load %arg7[%c0_3, %c0_4] : memref<8x256xf32, #tpu.memory_space<vmem>>, vector<8x128xf32>
    tpu.vector_store %arg7[%c0_3, %c0_4], %4 {strides = array<i32>} : memref<8x256xf32, #tpu.memory_space<vmem>>, vector<8x128xf32>,
    %c0_5 = arith.constant 0 : index
    %c0_6 = arith.constant 0 : index
    %6 = vector.load %arg7[%c0_5, %c0_6] : memref<8x256xf32, #tpu.memory_space<vmem>>, vector<8x256xf32>
    %c0_7 = arith.constant 0 : index
    %c0_8 = arith.constant 0 : index
    %7 = vector.load %arg3[%c0_7, %c0_8] : memref<256x128xf32, #tpu.memory_space<vmem>>, vector<256x128xf32>
    %cst = arith.constant dense<0.000000e+00> : vector<8x128xf32>
    %8 = tpu.matmul %6, %7, %cst {dimension_numbers = #tpu.dot_dimension_numbers<[1], [0], [0], [1], [0, 0, 1, 1], [], []>, precision = #tpu.contract_precision<fp32>} : vector<8x256xf32>, vector<256x128xf32>, vector<8x128xf32> -> vector<8x128xf32>
    %c0_9 = arith.constant 0 : index
    %c0_10 = arith.constant 0 : index
    %9 = vector.load %arg4[%c0_9, %c0_10] : memref<1x128xf32, #tpu.memory_space<vmem>>, vector<1x128xf32>
    %10 = vector.broadcast %9 : vector<1x128xf32> to vector<8x128xf32>
    %11 = arith.addf %8, %10 : vector<8x128xf32>
    %12 = tpu.iota {dimensions = array<i32: 1>} : vector<8x128xi32>
    %c32_i32 = arith.constant 32 : i32
    %13 = vector.broadcast %c32_i32 : i32 to vector<8x128xi32>
    %14 = arith.cmpi slt, %12, %13 : vector<8x128xi32>
    %cst_11 = arith.constant 0.000000e+00 : f32
    %15 = vector.broadcast %cst_11 : f32 to vector<8x128xf32>
    %16 = arith.select %14, %11, %15 : vector<8x128xi1>, vector<8x128xf32>
    %c0_12 = arith.constant 0 : index
    %c128 = arith.constant 128 : index
    %17 = vector.load %arg7[%c0_12, %c128] : memref<8x256xf32, #tpu.memory_space<vmem>>, vector<8x128xf32>
    tpu.vector_store %arg7[%c0_12, %c128], %16 {strides = array<i32>} : memref<8x256xf32, #tpu.memory_space<vmem>>, vector<8x128xf32>,
    %c0_13 = arith.constant 0 : index
    %c0_14 = arith.constant 0 : index
    %18 = vector.load %arg6[%c0_13, %c0_14] : memref<8x128xf32, #tpu.memory_space<vmem>>, vector<8x128xf32>
    tpu.vector_store %arg6[%c0_13, %c0_14], %16 {strides = array<i32>} : memref<8x128xf32, #tpu.memory_space<vmem>>, vector<8x128xf32>,
    %c32_i32_15 = arith.constant 32 : i32
    %19 = vector.broadcast %c32_i32_15 : i32 to vector<8x128xi32>
    %20 = arith.cmpi sge, %12, %19 : vector<8x128xi32>
    %c42_i32 = arith.constant 42 : i32
    %21 = vector.broadcast %c42_i32 : i32 to vector<8x128xi32>
    %22 = arith.cmpi slt, %12, %21 : vector<8x128xi32>
    %23 = arith.andi %20, %22 : vector<8x128xi1>
    %cst_16 = arith.constant -1.000000e+30 : f32
    %24 = vector.broadcast %cst_16 : f32 to vector<8x128xf32>
    %25 = arith.select %23, %11, %24 : vector<8x128xi1>, vector<8x128xf32>
    %cst_17 = arith.constant dense<0xFF800000> : vector<8xf32>
    %26 = vector.multi_reduction <maximumf>, %25, %cst_17 [1] : vector<8x128xf32> to vector<8xf32>
    %27 = vector.shape_cast %26 : vector<8xf32> to vector<8x1xf32>
    %28 = vector.broadcast %27 : vector<8x1xf32> to vector<8x128xf32>
    %29 = arith.subf %25, %28 : vector<8x128xf32>
    %30 = math.exp %29 : vector<8x128xf32>
    %cst_18 = arith.constant dense<0.000000e+00> : vector<8xf32>
    %31 = vector.multi_reduction <add>, %30, %cst_18 [1] : vector<8x128xf32> to vector<8xf32>
    %32 = vector.shape_cast %31 : vector<8xf32> to vector<8x1xf32>
    %33 = math.log %32 : vector<8x1xf32>
    %34 = vector.broadcast %33 : vector<8x1xf32> to vector<8x128xf32>
    %35 = arith.subf %29, %34 : vector<8x128xf32>
    %c0_19 = arith.constant 0 : index
    %c0_20 = arith.constant 0 : index
    %c0_21 = arith.constant 0 : index
    %36 = vector.load %arg5[%c0_19, %c0_20, %c0_21] : memref<1x8x128xf32, #tpu.memory_space<vmem>>, vector<1x8x128xf32>
    %37 = vector.shape_cast %36 : vector<1x8x128xf32> to vector<8x128xf32>
    %38 = vector.shape_cast %35 : vector<8x128xf32> to vector<1x8x128xf32>
    tpu.vector_store %arg5[%c0_19, %c0_20, %c0_21], %38 {strides = array<i32>} : memref<1x8x128xf32, #tpu.memory_space<vmem>>, vector<1x8x128xf32>,
    return
  }
  func.func @transform_0(%arg0: i32) -> (i32, i32, i32) {
    %c0_i32 = arith.constant 0 : i32
    %c0_i32_0 = arith.constant 0 : i32
    %c0_i32_1 = arith.constant 0 : i32
    return %arg0, %c0_i32, %c0_i32_0 : i32, i32, i32
  }
  func.func @transform_1(%arg0: i32) -> (i32, i32) {
    %c0_i32 = arith.constant 0 : i32
    %c0_i32_0 = arith.constant 0 : i32
    %c0_i32_1 = arith.constant 0 : i32
    return %c0_i32, %c0_i32_0 : i32, i32
  }
  func.func @transform_2(%arg0: i32) -> (i32, i32) {
    %c0_i32 = arith.constant 0 : i32
    %c0_i32_0 = arith.constant 0 : i32
    %c0_i32_1 = arith.constant 0 : i32
    return %c0_i32, %c0_i32_0 : i32, i32
  }
  func.func @transform_3(%arg0: i32) -> (i32, i32) {
    %c0_i32 = arith.constant 0 : i32
    %c0_i32_0 = arith.constant 0 : i32
    %c0_i32_1 = arith.constant 0 : i32
    return %c0_i32, %c0_i32_0 : i32, i32
  }
  func.func @transform_4(%arg0: i32) -> (i32, i32, i32) {
    %c0_i32 = arith.constant 0 : i32
    %c0_i32_0 = arith.constant 0 : i32
    %c0_i32_1 = arith.constant 0 : i32
    return %arg0, %c0_i32, %c0_i32_0 : i32, i32, i32
  }
  func.func @transform_5(%arg0: i32) -> (i32, i32) {
    %c0_i32 = arith.constant 0 : i32
    %c0_i32_0 = arith.constant 0 : i32
    %c0_i32_1 = arith.constant 0 : i32
    return %c0_i32, %c0_i32_0 : i32, i32
  }
}

</mosaic_0001>

<bundles_post_ra>
// kernel: rnnet_forward_seq.1
= control target key start
LH: loop header
LB: loop body
LE: loop exit
PB: predicated region body
PF: predicated region fallthrough
CT: control target
= control target key end

     0   :  { %s1905_s2 = inlined_call_operand.vmem [shape: f32[256,128], index: 2, kind: input, shape index: {}]   ;;  %s1906_s1 = inlined_call_operand.vmem [shape: f32[8,128], index: 1, kind: input, shape index: {}, may-alias: {1,5}]   ;;  %s1907_s0 = inlined_call_operand.vmem [shape: f32[1,8,128], index: 0, kind: input, shape index: {}]   ;;  %s1908_s3 = inlined_call_operand.vmem [shape: f32[1,128], index: 3, kind: input, shape index: {}]   ;;  %s1909_s5 = inlined_call_operand.vmem [shape: f32[8,128], index: 5, kind: output, shape index: {1}, may-alias: {1,5}]   ;;  %s1910_s4 = inlined_call_operand.vmem [shape: f32[1,8,128], index: 4, kind: output, shape index: {0}]  }
   0x1   :  { %v45_v0 = vld [vmem:[%s1905_s2 + $0x80] sm:$0xff]  ;;  %v46_v1 = vld [vmem:[%s1905_s2 + $0x88] sm:$0xff]  ;;  %v47_v7 = vld [vmem:[%s1905_s2 + $0x90] sm:$0xff] }
   0x2   :  { %v29_v2 = vld [vmem:[%s1905_s2] sm:$0xff]  ;;  %v117_v3 = vand.u32 4294901760, %v45_v0  ;;  %v120_v4 = vand.u32 4294901760, %v46_v1  ;;  %v30_v5 = vld [vmem:[%s1905_s2 + $0x8] sm:$0xff]  ;;  %v48_v8 = vld [vmem:[%s1905_s2 + $0x98] sm:$0xff]  ;;  %v123_v10 = vand.u32 4294901760, %v47_v7 }
   0x3   :  { %v69_v6 = vand.u32 4294901760, %v29_v2  ;;  %v72_v9 = vand.u32 4294901760, %v30_v5  ;;  %v126_v11 = vand.u32 4294901760, %v48_v8  ;;  %v31_v12 = vld [vmem:[%s1905_s2 + $0x10] sm:$0xff]  ;;  %v32_v13 = vld [vmem:[%s1905_s2 + $0x18] sm:$0xff]  ;;  %v49_v18 = vld [vmem:[%s1905_s2 + $0xa0] sm:$0xff] }
   0x4   :  { %v1420_v14 = vpack.c.bf16 %v120_v4, %v117_v3  ;;  %v75_v16 = vand.u32 4294901760, %v31_v12  ;;  %v78_v17 = vand.u32 4294901760, %v32_v13  ;;  %v50_v19 = vld [vmem:[%s1905_s2 + $0xa8] sm:$0xff]  ;;  %v33_v23 = vld [vmem:[%s1905_s2 + $0x20] sm:$0xff]  ;;  %v1443_v25 = vsub.f32 %v47_v7, %v123_v10  ;;  %v51_v37 = vld [vmem:[%s1905_s2 + $0xb0] sm:$0xff] }
   0x5   :  { %v1422_v15 = vsub.f32 %v29_v2, %v69_v6  ;;  %v1430_v20 = vpack.c.bf16 %v72_v9, %v69_v6  ;;  %v1432_v21 = vsub.f32 %v30_v5, %v72_v9  ;;  %v1434_v22 = vpack.c.bf16 %v126_v11, %v123_v10  ;;  %v34_v24 = vld [vmem:[%s1905_s2 + $0x28] sm:$0xff]  ;;  %v52_v42 = vld [vmem:[%s1905_s2 + $0xb8] sm:$0xff]  ;;  %v35_v55 = vld [vmem:[%s1905_s2 + $0x30] sm:$0xff] }
   0x6   :  { %1171 = vmatprep.subr.bf16.mxu0 %v1420_v14  ;;  %v1445_v26 = vsub.f32 %v48_v8, %v126_v11  ;;  %v1447_v27 = vpack.c.bf16 %v78_v17, %v75_v16  ;;  %v1449_v28 = vsub.f32 %v31_v12, %v75_v16  ;;  %v129_v29 = vand.u32 4294901760, %v49_v18  ;;  %v36_v56 = vld [vmem:[%s1905_s2 + $0x38] sm:$0xff]  ;;  %v53_v5 = vld [vmem:[%s1905_s2 + $0xc0] sm:$0xff]  ;;  %v54_v6 = vld [vmem:[%s1905_s2 + $0xc8] sm:$0xff] }
   0x7   :  { %1173 = vmatpush3.bf16.msra.mxu0 %v1430_v20  ;;  %v132_v30 = vand.u32 4294901760, %v50_v19  ;;  %v1452_v31 = vsub.f32 %v45_v0, %v117_v3  ;;  %v1454_v32 = vsub.f32 %v46_v1, %v120_v4  ;;  %v81_v33 = vand.u32 4294901760, %v33_v23  ;;  %v37_v11 = vld [vmem:[%s1905_s2 + $0x40] sm:$0xff] }
   0x8   :  { %1175 = vmatprep.subr.bf16.mxu0 %v1434_v22  ;;  %v84_v34 = vand.u32 4294901760, %v34_v24  ;;  %v1927_v35 = vand.u32 4294901760, %v1422_v15  ;;  %v1926_v36 = vand.u32 4294901760, %v1432_v21  ;;  %v1462_v38 = vsub.f32 %v32_v13, %v78_v17 }
   0x9   :  { %v1464_v39 = vpack.c.bf16 %v132_v30, %v129_v29  ;;  %v1466_v40 = vsub.f32 %v49_v18, %v129_v29  ;;  %v1932_v41 = vand.u32 4294901760, %v1452_v31  ;;  %v1472_v43 = vsub.f32 %v50_v19, %v132_v30  ;;  %v38_v29 = vld [vmem:[%s1905_s2 + $0x48] sm:$0xff] }
   0xa   :  { %v1929_v44 = vand.u32 4294901760, %v1454_v32  ;;  %v1475_v45 = vpack.c.bf16 %v84_v34, %v81_v33  ;;  %v1477_v46 = vsub.f32 %v33_v23, %v81_v33  ;;  %v184_v48 = vsub.f32 %v1422_v15, %v1927_v35 }
   0xb   :  { %1177 = vmatpush3.bf16.msra.mxu0 %v1447_v27  ;;  %v296_v47 = vsub.f32 %v1452_v31, %v1932_v41  ;;  %v191_v49 = vsub.f32 %v1432_v21, %v1926_v36  ;;  %v135_v50 = vand.u32 4294901760, %v51_v37  ;;  %v138_v52 = vand.u32 4294901760, %v52_v42 }
   0xc   :  { %1179 = vmatprep.subr.bf16.mxu0 %v1464_v39  ;;  %v303_v51 = vsub.f32 %v1454_v32, %v1929_v44  ;;  %v1924_v53 = vand.u32 4294901760, %v1443_v25  ;;  %v1923_v54 = vand.u32 4294901760, %v1445_v26  ;;  %v1501_v58 = vsub.f32 %v34_v24, %v84_v34 }
   0xd   :  { %v297_v57 = vand.u32 4294901760, %v296_v47  ;;  %v185_v59 = vand.u32 4294901760, %v184_v48  ;;  %v192_v60 = vand.u32 4294901760, %v191_v49  ;;  %v1503_v62 = vpack.c.bf16 %v138_v52, %v135_v50 }
   0xe   :  { %v304_v61 = vand.u32 4294901760, %v303_v51  ;;  %v1505_v63 = vsub.f32 %v51_v37, %v135_v50  ;;  %v310_v0 = vsub.f32 %v1443_v25, %v1924_v53  ;;  %v317_v2 = vsub.f32 %v1445_v26, %v1923_v54 }
   0xf   :  { %1181 = vmatpush3.bf16.msra.mxu0 %v1475_v45  ;;  %v1204_v1 = vpack.c.bf16 %v192_v60, %v185_v59  ;;  %v87_v3 = vand.u32 4294901760, %v35_v55  ;;  %v90_v4 = vand.u32 4294901760, %v36_v56  ;;  %v1922_v9 = vand.u32 4294901760, %v1449_v28 }
  0x10   :  { %v1202_v7 = vpack.c.bf16 %v304_v61, %v297_v57  ;;  %1183 = vmatprep.subr.bf16.mxu0 %v1503_v62  ;;  %v311_v8 = vand.u32 4294901760, %v310_v0  ;;  %v1919_v10 = vand.u32 4294901760, %v1462_v38  ;;  %v1526_v12 = vsub.f32 %v52_v42, %v138_v52  ;;  %v56_v57 = vld [vmem:[%s1905_s2 + $0xd8] sm:$0xff] }
  0x11   :  { %v318_v13 = vand.u32 4294901760, %v317_v2  ;;  %v1528_v16 = vpack.c.bf16 %v90_v4, %v87_v3  ;;  %v1530_v17 = vsub.f32 %v35_v55, %v87_v3  ;;  %v198_v18 = vsub.f32 %v1449_v28, %v1922_v9 }
  0x12   :  { %1203 = vmatprep.subr.bf16.mxu1 %v1202_v7  ;;  %v205_v19 = vsub.f32 %v1462_v38, %v1919_v10  ;;  %v141_v23 = vand.u32 4294901760, %v53_v5  ;;  %v144_v24 = vand.u32 4294901760, %v54_v6  ;;  %v1917_v33 = vand.u32 4294901760, %v1466_v40 }
  0x13   :  { %1205 = vmatpush3.bf16.msra.mxu1 %v1204_v1  ;;  %v1206_v30 = vpack.c.bf16 %v318_v13, %v311_v8  ;;  %1185 = vmatpush3.bf16.msra.mxu0 %v1528_v16  ;;  %v1916_v34 = vand.u32 4294901760, %v1472_v43  ;;  %v93_v37 = vand.u32 4294901760, %v37_v11  ;;  %v1544_v42 = vsub.f32 %v36_v56, %v90_v4  ;;  %v55_v56 = vld [vmem:[%s1905_s2 + $0xd0] sm:$0xff] }
  0x14   :  { %v199_v47 = vand.u32 4294901760, %v198_v18  ;;  %v206_v48 = vand.u32 4294901760, %v205_v19  ;;  %v1546_v49 = vpack.c.bf16 %v144_v24, %v141_v23  ;;  %v1548_v50 = vsub.f32 %v53_v5, %v141_v23  ;;  %v39_v1 = vld [vmem:[%s1905_s2 + $0x50] sm:$0xff]  ;;  %v40_v18 = vld [vmem:[%s1905_s2 + $0x58] sm:$0xff] }
  0x15   :  { %1207 = vmatprep.subr.bf16.mxu1 %v1206_v30  ;;  %v324_v51 = vsub.f32 %v1466_v40, %v1917_v33  ;;  %v331_v52 = vsub.f32 %v1472_v43, %v1916_v34  ;;  %v96_v55 = vand.u32 4294901760, %v38_v29  ;;  %v1563_v60 = vsub.f32 %v54_v6, %v144_v24 }
  0x16   :  { %v1208_v59 = vpack.c.bf16 %v206_v48, %v199_v47  ;;  %1187 = vmatprep.subr.bf16.mxu0 %v1546_v49  ;;  %v1914_v61 = vand.u32 4294901760, %v1477_v46  ;;  %v1913_v0 = vand.u32 4294901760, %v1501_v58  ;;  %v1572_v5 = vsub.f32 %v37_v11, %v93_v37 }
  0x17   :  { %v325_v2 = vand.u32 4294901760, %v324_v51  ;;  %v332_v3 = vand.u32 4294901760, %v331_v52  ;;  %v1570_v4 = vpack.c.bf16 %v96_v55, %v93_v37  ;;  %v147_v8 = vand.u32 4294901760, %v55_v56 }
  0x18   :  { %1209 = vmatpush3.bf16.msra.mxu1 %v1208_v59  ;;  %v212_v6 = vsub.f32 %v1477_v46, %v1914_v61  ;;  %v219_v7 = vsub.f32 %v1501_v58, %v1913_v0  ;;  %v150_v13 = vand.u32 4294901760, %v56_v57  ;;  %v1912_v11 = vand.u32 4294901760, %v1505_v63 }
  0x19   :  { %v1210_v19 = vpack.c.bf16 %v332_v3, %v325_v2  ;;  %1189 = vmatpush3.bf16.msra.mxu0 %v1570_v4  ;;  %v1911_v23 = vand.u32 4294901760, %v1526_v12  ;;  %v99_v24 = vand.u32 4294901760, %v39_v1  ;;  %v1586_v30 = vsub.f32 %v38_v29, %v96_v55  ;;  %v57_v29 = vld [vmem:[%s1905_s2 + $0xe0] sm:$0xff]  ;;  %v58_v55 = vld [vmem:[%s1905_s2 + $0xe8] sm:$0xff] }
  0x1a   :  { %v213_v37 = vand.u32 4294901760, %v212_v6  ;;  %v220_v47 = vand.u32 4294901760, %v219_v7  ;;  %v1588_v48 = vpack.c.bf16 %v150_v13, %v147_v8  ;;  %v1590_v51 = vsub.f32 %v55_v56, %v147_v8  ;;  %v41_v8 = vld [vmem:[%s1905_s2 + $0x60] sm:$0xff] }
  0x1b   :  { %1211 = vmatprep.subr.bf16.mxu1 %v1210_v19  ;;  %v338_v52 = vsub.f32 %v1505_v63, %v1912_v11  ;;  %v345_v59 = vsub.f32 %v1526_v12, %v1911_v23  ;;  %v102_v2 = vand.u32 4294901760, %v40_v18  ;;  %v1605_v56 = vsub.f32 %v56_v57, %v150_v13 }
  0x1c   :  { %v1212_v3 = vpack.c.bf16 %v220_v47, %v213_v37  ;;  %1191 = vmatprep.subr.bf16.mxu0 %v1588_v48  ;;  %v1915_v6 = vand.u32 4294901760, %v1530_v17  ;;  %v1918_v7 = vand.u32 4294901760, %v1544_v42  ;;  %v1614_v0 = vsub.f32 %v39_v1, %v99_v24 }
  0x1d   :  { %v339_v19 = vand.u32 4294901760, %v338_v52  ;;  %v346_v23 = vand.u32 4294901760, %v345_v59  ;;  %v1612_v11 = vpack.c.bf16 %v102_v2, %v99_v24  ;;  %v153_v37 = vand.u32 4294901760, %v57_v29  ;;  %v42_v52 = vld [vmem:[%s1905_s2 + $0x68] sm:$0xff] }
  0x1e   :  { %1213 = vmatpush3.bf16.msra.mxu1 %v1212_v3  ;;  %v226_v57 = vsub.f32 %v1530_v17, %v1915_v6  ;;  %v233_v13 = vsub.f32 %v1544_v42, %v1918_v7  ;;  %v156_v47 = vand.u32 4294901760, %v58_v55  ;;  %v1921_v1 = vand.u32 4294901760, %v1548_v50 }
  0x1f   :  { %1956 = vst [vmem:[#allocation3_spill] sm:$0xff] %v1612_v11  ;;  %v1214_v59 = vpack.c.bf16 %v346_v23, %v339_v19  ;;  %1193 = vmatpush3.bf16.msra.mxu0 %v1612_v11  ;;  %v1920_v24 = vand.u32 4294901760, %v1563_v60  ;;  %v105_v3 = vand.u32 4294901760, %v41_v8  ;;  %v1628_v61 = vsub.f32 %v40_v18, %v102_v2  ;;  %v59_v18 = vld [vmem:[%s1905_s2 + $0xf0] sm:$0xff]  ;;  %v60_v2 = vld [vmem:[%s1905_s2 + $0xf8] sm:$0xff] }
  0x20   :  { %v227_v6 = vand.u32 4294901760, %v226_v57  ;;  %v234_v34 = vand.u32 4294901760, %v233_v13  ;;  %v1630_v33 = vpack.c.bf16 %v156_v47, %v153_v37  ;;  %v1632_v7 = vsub.f32 %v57_v29, %v153_v37 }
  0x21   :  { %1215 = vmatprep.subr.bf16.mxu1 %v1214_v59  ;;  %v352_v23 = vsub.f32 %v1548_v50, %v1921_v1  ;;  %v359_v19 = vsub.f32 %v1563_v60, %v1920_v24  ;;  %v108_v10 = vand.u32 4294901760, %v42_v52  ;;  %v1647_v29 = vsub.f32 %v58_v55, %v156_v47  ;;  %v43_v59 = vld [vmem:[%s1905_s2 + $0x70] sm:$0xff] }
  0x22   :  { %1957 = vst [vmem:[#allocation4_spill] sm:$0xff] %v1630_v33  ;;  %v1216_v57 = vpack.c.bf16 %v234_v34, %v227_v6  ;;  %1195 = vmatprep.subr.bf16.mxu0 %v1630_v33  ;;  %v1925_v13 = vand.u32 4294901760, %v1572_v5  ;;  %v1928_v37 = vand.u32 4294901760, %v1586_v30  ;;  %v1656_v54 = vsub.f32 %v41_v8, %v105_v3 }
  0x23   :  { %v353_v24 = vand.u32 4294901760, %v352_v23  ;;  %v360_v1 = vand.u32 4294901760, %v359_v19  ;;  %v1654_v9 = vpack.c.bf16 %v108_v10, %v105_v3  ;;  %v159_v6 = vand.u32 4294901760, %v59_v18  ;;  %v44_v23 = vld [vmem:[%s1905_s2 + $0x78] sm:$0xff] }
  0x24   :  { %1217 = vmatpush3.bf16.msra.mxu1 %v1216_v57  ;;  %v240_v34 = vsub.f32 %v1572_v5, %v1925_v13  ;;  %v247_v55 = vsub.f32 %v1586_v30, %v1928_v37  ;;  %v162_v47 = vand.u32 4294901760, %v60_v2  ;;  %v1931_v8 = vand.u32 4294901760, %v1590_v51 }
  0x25   :  { %1958 = vst [vmem:[#allocation5_spill] sm:$0xff] %v1654_v9  ;;  %v1218_v19 = vpack.c.bf16 %v360_v1, %v353_v24  ;;  %1197 = vmatpush3.bf16.msra.mxu0 %v1654_v9  ;;  %v1930_v3 = vand.u32 4294901760, %v1605_v56  ;;  %v111_v57 = vand.u32 4294901760, %v43_v59  ;;  %v1670_v53 = vsub.f32 %v42_v52, %v108_v10  ;;  %v23_v10 = vld [vmem:[%s1906_s1] sm:$0xff] }
  0x26   :  { %v241_v13 = vand.u32 4294901760, %v240_v34  ;;  %v248_v36 = vand.u32 4294901760, %v247_v55  ;;  %v1672_v35 = vpack.c.bf16 %v162_v47, %v159_v6  ;;  %v1674_v37 = vsub.f32 %v59_v18, %v159_v6  ;;  %v25_v6 = vld [vmem:[%s1907_s0] sm:$0xff] }
  0x27   :  { %1219 = vmatprep.subr.bf16.mxu1 %v1218_v19  ;;  %v366_v1 = vsub.f32 %v1590_v51, %v1931_v8  ;;  %v373_v24 = vsub.f32 %v1605_v56, %v1930_v3  ;;  %v114_v44 = vand.u32 4294901760, %v44_v23  ;;  %v1686_v34 = vsub.f32 %v60_v2, %v162_v47 }
  0x28   :  { %1959 = vst [vmem:[#allocation6_spill] sm:$0xff] %v1672_v35  ;;  %v1220_v52 = vpack.c.bf16 %v248_v36, %v241_v13  ;;  %1199 = vmatprep.subr.bf16.mxu0 %v1672_v35  ;;  %v1935_v18 = vand.u32 4294901760, %v1614_v0  ;;  %v1936_v55 = vand.u32 4294901760, %v1628_v61  ;;  %v1695_v41 = vsub.f32 %v43_v59, %v111_v57 }
  0x29   :  { %v367_v19 = vand.u32 4294901760, %v366_v1  ;;  %v374_v3 = vand.u32 4294901760, %v373_v24  ;;  %v1693_v8 = vpack.c.bf16 %v114_v44, %v111_v57  ;;  %v1703_v13 = vand.u32 4294901760, %v23_v10 }
  0x2a   :  { %1221 = vmatpush3.bf16.msra.mxu1 %v1220_v52  ;;  %v254_v36 = vsub.f32 %v1614_v0, %v1935_v18  ;;  %v261_v2 = vsub.f32 %v1628_v61, %v1936_v55  ;;  %v1939_v47 = vand.u32 4294901760, %v1632_v7  ;;  %v1945_v1 = vand.u32 4294901760, %v1647_v29 }
  0x2b   :  { %1960 = vst [vmem:[#allocation7_spill] sm:$0xff] %v1693_v8  ;;  %1961 = vst [vmem:[#allocation8_spill] sm:$0xff] %v1703_v13  ;;  %v1222_v35 = vpack.c.bf16 %v374_v3, %v367_v19  ;;  %1201 = vmatpush3.bf16.msra.mxu0 %v1693_v8  ;;  %v1234_v59 = vpack.c.bf16 %v1454_v32, %v1452_v31  ;;  %v1710_v57 = vand.u32 4294901760, %v25_v6  ;;  %405 = vmatprep.mubr.f32.mxu1 %v1703_v13 }
  0x2c   :  { %v255_v24 = vand.u32 4294901760, %v254_v36  ;;  %v262_v52 = vand.u32 4294901760, %v261_v2  ;;  %v1713_v18 = vsub.f32 %v23_v10, %v1703_v13  ;;  %v380_v55 = vsub.f32 %v1632_v7, %v1939_v47 }
  0x2d   :  { %1223 = vmatprep.subr.bf16.mxu1 %v1222_v35  ;;  %v387_v3 = vsub.f32 %v1647_v29, %v1945_v1  ;;  %1235 = vmatprep.subr.bf16.mxu0 %v1234_v59  ;;  %v1723_v19 = vsub.f32 %v25_v6, %v1710_v57  ;;  %v1944_v36 = vand.u32 4294901760, %v1656_v54  ;;  %v1946_v10 = vand.u32 4294901760, %v1670_v53 }
  0x2e   :  { %v1727_v2 = vsub.f32 %v44_v23, %v114_v44  ;;  %v1224_v8 = vpack.c.bf16 %v262_v52, %v255_v24  ;;  %v1947_v47 = vand.u32 4294901760, %v1713_v18  ;;  %v381_v9 = vand.u32 4294901760, %v380_v55 }
  0x2f   :  { %v388_v13 = vand.u32 4294901760, %v387_v3  ;;  %v172_v35 = vand.u32 4294901760, %v1723_v19  ;;  %v268_v59 = vsub.f32 %v1656_v54, %v1944_v36  ;;  %v275_v6 = vsub.f32 %v1670_v53, %v1946_v10 }
  0x30   :  { %1225 = vmatpush3.bf16.msra.mxu1 %v1224_v8  ;;  %v167_v44 = vsub.f32 %v1713_v18, %v1947_v47  ;;  %v1236_v23 = vpack.c.bf16 %v1432_v21, %v1422_v15  ;;  %v1952_v55 = vand.u32 4294901760, %v1674_v37  ;;  %v1955_v24 = vand.u32 4294901760, %v1686_v34 }
  0x31   :  { %v1226_v52 = vpack.c.bf16 %v388_v13, %v381_v9  ;;  %v173_v3 = vsub.f32 %v1723_v19, %v172_v35  ;;  %v269_v36 = vand.u32 4294901760, %v268_v59  ;;  %v276_v1 = vand.u32 4294901760, %v275_v6 }
  0x32   :  { %v168_v10 = vand.u32 4294901760, %v167_v44  ;;  %v394_v8 = vsub.f32 %v1674_v37, %v1952_v55  ;;  %v401_v47 = vsub.f32 %v1686_v34, %v1955_v24  ;;  %v1954_v33 = vand.u32 4294901760, %v1695_v41 }
  0x33   :  { %1227 = vmatprep.subr.bf16.mxu1 %v1226_v52  ;;  %v174_v11 = vand.u32 4294901760, %v173_v3  ;;  %v1228_v9 = vpack.c.bf16 %v276_v1, %v269_v36  ;;  %v1238_v13 = vpack.c.bf16 %v1445_v26, %v1443_v25  ;;  %v1953_v59 = vand.u32 4294901760, %v1727_v2 }
  0x34   :  { %169 = vmatprep.mubr.f32.mxu0 %v168_v10  ;;  %v395_v6 = vand.u32 4294901760, %v394_v8  ;;  %v402_v44 = vand.u32 4294901760, %v401_v47  ;;  %v282_v55 = vsub.f32 %v1695_v41, %v1954_v33  ;;  %v1240_v3 = vpack.c.bf16 %v1462_v38, %v1449_v28 }
  0x35   :  { %175 = vmatmul.mubr.f32.vlgmr.msra.gmra.mrb[0].mxu0 %v174_v11  ;;  %1229 = vmatpush3.bf16.msra.mxu1 %v1228_v9  ;;  %v289_v52 = vsub.f32 %v1727_v2, %v1953_v59  ;;  %v1242_v10 = vpack.c.bf16 %v1472_v43, %v1466_v40  ;;  %v1244_v11 = vpack.c.bf16 %v1501_v58, %v1477_v46  ;;  %v1963_v9 = vand.u32 4294901760, %v1454_v32 }
  0x36   :  { %1237 = vmatpush3.bf16.msra.mxu0 %v1236_v23  ;;  %v1230_v1 = vpack.c.bf16 %v402_v44, %v395_v6  ;;  %v283_v36 = vand.u32 4294901760, %v282_v55  ;;  %542 = vmatprep.mubr.f32.mxu0 %v1713_v18  ;;  %v1246_v8 = vpack.c.bf16 %v1526_v12, %v1505_v63  ;;  %v1962_v55 = vand.u32 4294901760, %v1452_v31 }
  0x37   :  { %1239 = vmatprep.subr.bf16.mxu0 %v1238_v13  ;;  %v290_v47 = vand.u32 4294901760, %v289_v52  ;;  %v1964_v44 = vand.u32 4294901760, %v1422_v15  ;;  %v1965_v13 = vand.u32 4294901760, %v1432_v21  ;;  %v1966_v59 = vand.u32 4294901760, %v1443_v25 }
  0x38   :  { %1231 = vmatprep.subr.bf16.mxu1 %v1230_v1  ;;  %v1298_v6 = vpack.c.bf16 %v1963_v9, %v1962_v55  ;;  %v1967_v1 = vand.u32 4294901760, %v1445_v26  ;;  %v1968_v24 = vand.u32 4294901760, %v1449_v28  ;;  %v1970_v31 = vand.u32 4294901760, %v1466_v40 }
  0x39   :  { %v1232_v23 = vpack.c.bf16 %v290_v47, %v283_v36  ;;  %v1300_v52 = vpack.c.bf16 %v1965_v13, %v1964_v44  ;;  %v1969_v36 = vand.u32 4294901760, %v1462_v38  ;;  %v1971_v32 = vand.u32 4294901760, %v1472_v43  ;;  %v1986_v13 = vld [vmem:[#allocation5_spill] sm:$0xff] }
  0x3a   :  { %v1302_v33 = vpack.c.bf16 %v1967_v1, %v1966_v59  ;;  %1241 = vmatpush3.bf16.msra.mxu0 %v1240_v3  ;;  %v1972_v15 = vand.u32 4294901760, %v1477_v46  ;;  %v1973_v21 = vand.u32 4294901760, %v1501_v58  ;;  %v1974_v25 = vand.u32 4294901760, %v1505_v63  ;;  %v1987_v1 = vld [vmem:[#allocation6_spill] sm:$0xff] }
  0x3b   :  { %v1304_v47 = vpack.c.bf16 %v1969_v36, %v1968_v24  ;;  %v1306_v55 = vpack.c.bf16 %v1971_v32, %v1970_v31  ;;  %v1975_v26 = vand.u32 4294901760, %v1526_v12  ;;  %1233 = vmatpush3.bf16.msra.mxu1 %v1232_v23  ;;  %1243 = vmatprep.subr.bf16.mxu0 %v1242_v10  ;;  %v1976_v28 = vand.u32 4294901760, %v1530_v17  ;;  %v1988_v36 = vld [vmem:[#allocation7_spill] sm:$0xff] }
  0x3c   :  { %v1308_v9 = vpack.c.bf16 %v1973_v21, %v1972_v15  ;;  %v1977_v38 = vand.u32 4294901760, %v1544_v42  ;;  %v1978_v43 = vand.u32 4294901760, %v1548_v50  ;;  %v1979_v24 = vand.u32 4294901760, %v1563_v60  ;;  %1267 = vmatprep.subr.bf16.mxu1 %v1420_v14 }
  0x3d   :  { %v1310_v59 = vpack.c.bf16 %v1975_v26, %v1974_v25  ;;  %v1980_v58 = vand.u32 4294901760, %v1572_v5  ;;  %v1981_v3 = vand.u32 4294901760, %v1586_v30  ;;  %v1248_v12 = vpack.c.bf16 %v1544_v42, %v1530_v17 }
  0x3e   :  { %v1312_v40 = vpack.c.bf16 %v1977_v38, %v1976_v28  ;;  %v1314_v46 = vpack.c.bf16 %v1979_v24, %v1978_v43  ;;  %407 = vmatmul.mubr.f32.vlgmr.msra.gmra.mrb[0].mxu1 %v1710_v57  ;;  %1245 = vmatpush3.bf16.msra.mxu0 %v1244_v11  ;;  %v1250_v10 = vpack.c.bf16 %v1563_v60, %v1548_v50  ;;  %v1982_v23 = vand.u32 4294901760, %v1713_v18  ;;  %v1983_v18 = vld [vmem:[#allocation3_spill] sm:$0xff]  ;;  %v1984_v11 = vld [vmem:[#allocation4_spill] sm:$0xff] }
  0x3f   :  { %v1316_v63 = vpack.c.bf16 %v1981_v3, %v1980_v58  ;;  %1269 = vmatpush3.bf16.msra.mxu1 %v1430_v20  ;;  %1247 = vmatprep.subr.bf16.mxu0 %v1246_v8  ;;  %v1252_v44 = vpack.c.bf16 %v1586_v30, %v1572_v5  ;;  %v1254_v17 = vpack.c.bf16 %v1605_v56, %v1590_v51  ;;  %v1985_v8 = vld [vmem:[#allocation8_spill] sm:$0xff]  ;;  %v930_v26 = vlaneseq }
  0x40   :  { %1271 = vmatprep.subr.bf16.mxu1 %v1434_v22  ;;  %649 = vmatprep.mubr.f32.mxu1 %v1982_v23  ;;  %v1256_v42 = vpack.c.bf16 %v1628_v61, %v1614_v0  ;;  %v1258_v50 = vpack.c.bf16 %v1647_v29, %v1632_v7  ;;  %v1260_v60 = vpack.c.bf16 %v1670_v53, %v1656_v54 }
  0x41   :  { %v1262_v5 = vpack.c.bf16 %v1686_v34, %v1674_v37  ;;  %v1264_v30 = vpack.c.bf16 %v1727_v2, %v1695_v41  ;;  %v931_v38 = vand.u32 127, %v930_v26 }
  0x42   :  { %1249 = vmatpush3.bf16.msra.mxu0 %v1248_v12 }
  0x43   :  { %1273 = vmatpush3.bf16.msra.mxu1 %v1447_v27  ;;  %1251 = vmatprep.subr.bf16.mxu0 %v1250_v10  ;;  %vm936_vm0 = vcmp.ge.s32.totalorder %v931_v38, 32  ;;  %vm937_vm1 = vcmp.lt.s32.totalorder %v931_v38, 42  ;;  %vm932_vm2 = vcmp.lt.s32.totalorder %v931_v38, 32 }
  0x44   :  { %1275 = vmatprep.subr.bf16.mxu1 %v1464_v39  ;;  %vm938_vm3 = vmand %vm936_vm0, %vm937_vm1 }
  0x46   :  { %1253 = vmatpush3.bf16.msra.mxu0 %v1252_v44 }
  0x47   :  { %1277 = vmatpush3.bf16.msra.mxu1 %v1475_v45  ;;  %1255 = vmatprep.subr.bf16.mxu0 %v1254_v17 }
  0x48   :  { %1279 = vmatprep.subr.bf16.mxu1 %v1503_v62 }
  0x4a   :  { %1257 = vmatpush3.bf16.msra.mxu0 %v1256_v42 }
  0x4b   :  { %1281 = vmatpush3.bf16.msra.mxu1 %v1528_v16  ;;  %1259 = vmatprep.subr.bf16.mxu0 %v1258_v50 }
  0x4c   :  { %1283 = vmatprep.subr.bf16.mxu1 %v1546_v49 }
  0x4e   :  { %1261 = vmatpush3.bf16.msra.mxu0 %v1260_v60 }
  0x4f   :  { %1285 = vmatpush3.bf16.msra.mxu1 %v1570_v4  ;;  %1263 = vmatprep.subr.bf16.mxu0 %v1262_v5 }
  0x50   :  { %1287 = vmatprep.subr.bf16.mxu1 %v1588_v48 }
  0x52   :  { %1265 = vmatpush3.bf16.msra.mxu0 %v1264_v30 }
  0x53   :  { %1289 = vmatpush3.bf16.msra.mxu1 %v1983_v18  ;;  %1299 = vmatprep.subr.bf16.mxu0 %v1298_v6  ;;  %v1990_v6 = vand.u32 4294901760, %v1605_v56 }
  0x54   :  { %1291 = vmatprep.subr.bf16.mxu1 %v1984_v11 }
  0x55   :  { %545 = vmatmul.mubr.f32.vlgmr.msra.gmra.mrb[2].mxu0 %v1723_v19  ;;  %v1991_v19 = vand.u32 4294901760, %v1614_v0 }
  0x56   :  { %1301 = vmatpush3.bf16.msra.mxu0 %v1300_v52  ;;  %819 = vmatprep.mubr.f32.mxu0 %v1985_v8 }
  0x57   :  { %1293 = vmatpush3.bf16.msra.mxu1 %v1986_v13  ;;  %1303 = vmatprep.subr.bf16.mxu0 %v1302_v33  ;;  %v1989_v33 = vand.u32 4294901760, %v1590_v51  ;;  %v1995_v51 = vand.u32 4294901760, %v1656_v54 }
  0x58   :  { %1295 = vmatprep.subr.bf16.mxu1 %v1987_v1 }
  0x5a   :  { %1305 = vmatpush3.bf16.msra.mxu0 %v1304_v47 }
  0x5b   :  { %1297 = vmatpush3.bf16.msra.mxu1 %v1988_v36  ;;  %1307 = vmatprep.subr.bf16.mxu0 %v1306_v55 }
  0x5c   :  { %1331 = vmatprep.subr.bf16.mxu1 %v1420_v14  ;;  %v1318_v14 = vpack.c.bf16 %v1990_v6, %v1989_v33 }
  0x5e   :  { %653 = vmatmul.mubr.f32.vlgmr.msra.gmra.mrb[2].mxu1 %v172_v35  ;;  %1309 = vmatpush3.bf16.msra.mxu0 %v1308_v9 }
  0x5f   :  { %1333 = vmatpush3.bf16.msra.mxu1 %v1430_v20  ;;  %1311 = vmatprep.subr.bf16.mxu0 %v1310_v59  ;;  %v1992_v20 = vand.u32 4294901760, %v1628_v61  ;;  %v1997_v61 = vand.u32 4294901760, %v1674_v37 }
  0x60   :  { %1335 = vmatprep.subr.bf16.mxu1 %v1434_v22  ;;  %923 = vmatprep.mubr.f32.mxu1 %v1985_v8  ;;  %v1993_v22 = vand.u32 4294901760, %v1632_v7  ;;  %v1999_v7 = vand.u32 4294901760, %v1695_v41 }
  0x61   :  { %v1320_v35 = vpack.c.bf16 %v1992_v20, %v1991_v19 }
  0x62   :  { %1313 = vmatpush3.bf16.msra.mxu0 %v1312_v40 }
  0x63   :  { %1337 = vmatpush3.bf16.msra.mxu1 %v1447_v27  ;;  %1315 = vmatprep.subr.bf16.mxu0 %v1314_v46  ;;  %v1994_v27 = vand.u32 4294901760, %v1647_v29 }
  0x64   :  { %1339 = vmatprep.subr.bf16.mxu1 %v1464_v39  ;;  %v1996_v39 = vand.u32 4294901760, %v1670_v53 }
  0x65   :  { %v1322_v52 = vpack.c.bf16 %v1994_v27, %v1993_v22 }
  0x66   :  { %1317 = vmatpush3.bf16.msra.mxu0 %v1316_v63  ;;  %v1324_v56 = vpack.c.bf16 %v1996_v39, %v1995_v51 }
  0x67   :  { %1341 = vmatpush3.bf16.msra.mxu1 %v1475_v45  ;;  %1319 = vmatprep.subr.bf16.mxu0 %v1318_v14  ;;  %v1998_v45 = vand.u32 4294901760, %v1686_v34 }
  0x68   :  { %1343 = vmatprep.subr.bf16.mxu1 %v1503_v62  ;;  %v2000_v62 = vand.u32 4294901760, %v1727_v2 }
  0x69   :  { %v1326_v0 = vpack.c.bf16 %v1998_v45, %v1997_v61 }
  0x6a   :  { %1321 = vmatpush3.bf16.msra.mxu0 %v1320_v35  ;;  %v1328_v29 = vpack.c.bf16 %v2000_v62, %v1999_v7 }
  0x6b   :  { %1345 = vmatpush3.bf16.msra.mxu1 %v1528_v16  ;;  %1323 = vmatprep.subr.bf16.mxu0 %v1322_v52  ;;  %v959_v16 = vld [vmem:[%s1908_s3] ss:$0 sm:$0xff] }
  0x6c   :  { %1347 = vmatprep.subr.bf16.mxu1 %v1546_v49 }
  0x6e   :  { %1325 = vmatpush3.bf16.msra.mxu0 %v1324_v56 }
  0x6f   :  { %1349 = vmatpush3.bf16.msra.mxu1 %v1570_v4  ;;  %1327 = vmatprep.subr.bf16.mxu0 %v1326_v0 }
  0x70   :  { %1351 = vmatprep.subr.bf16.mxu1 %v1588_v48 }
  0x72   :  { %1329 = vmatpush3.bf16.msra.mxu0 %v1328_v29 }
  0x73   :  { %1353 = vmatpush3.bf16.msra.mxu1 %v1983_v18 }
  0x74   :  { %1355 = vmatprep.subr.bf16.mxu1 %v1984_v11 }
  0x75   :  { %821 = vmatmul.mubr.f32.vlgmr.msra.gmra.mrb[4].mxu0 %v1710_v57 }
  0x77   :  { %1357 = vmatpush3.bf16.msra.mxu1 %v1986_v13 }
  0x78   :  { %1359 = vmatprep.subr.bf16.mxu1 %v1987_v1 }
  0x7b   :  { %1361 = vmatpush3.bf16.msra.mxu1 %v1988_v36 }
  0x7e   :  { %925 = vmatmul.mubr.f32.vlgmr.msra.gmra.mrb[4].mxu1 %v1710_v57 }
 0x108   :  { %v992_v41 = vpop.f32.mrb[0].mxu0 }
 0x109   :  { %v993_v53 = vpop.f32.mrb[1].mxu0 }
 0x10a   :  { %v994_v54 = vadd.f32 %v993_v53, %v992_v41 }
 0x10c   :  { %v177_v49 = vadd.f32 %v994_v54, %v959_v16 }
 0x111   :  { %v1027_v4 = vpop.f32.mrb[0].mxu1 }
 0x112   :  { %v1028_v48 = vpop.f32.mrb[1].mxu1 }
 0x113   :  { %v1029_v37 = vadd.f32 %v1028_v48, %v1027_v4 }
 0x115   :  { %v409_v34 = vadd.f32 %v1029_v37, %v177_v49 }
 0x128   :  { %v1062_v2 = vpop.f32.mrb[2].mxu0 }
 0x129   :  { %v1063_v47 = vpop.f32.mrb[3].mxu0 }
 0x12a   :  { %v1064_v31 = vadd.f32 %v1063_v47, %v1062_v2 }
 0x12c   :  { %v547_v32 = vadd.f32 %v1064_v31, %v409_v34 }
 0x131   :  { %v1097_v55 = vpop.f32.mrb[2].mxu1 }
 0x132   :  { %v1098_v15 = vpop.f32.mrb[3].mxu1 }
 0x133   :  { %v1099_v21 = vadd.f32 %v1098_v15, %v1097_v55 }
 0x135   :  { %v655_v57 = vadd.f32 %v1099_v21, %v547_v32 }
 0x148   :  { %v1132_v9 = vpop.f32.mrb[4].mxu0 }
 0x149   :  { %v1133_v25 = vpop.f32.mrb[5].mxu0 }
 0x14a   :  { %v1134_v59 = vadd.f32 %v1133_v25, %v1132_v9 }
 0x14c   :  { %v823_v28 = vadd.f32 %v1134_v59, %v655_v57 }
 0x151   :  { %v1167_v40 = vpop.f32.mrb[4].mxu1 }
 0x152   :  { %v1168_v43 = vpop.f32.mrb[5].mxu1 }
 0x153   :  { %v1169_v24 = vadd.f32 %v1168_v43, %v1167_v40 }
 0x155   :  { %v927_v46 = vadd.f32 %v1169_v24, %v823_v28 }
 0x157   :  { %v939_v58 = vsel %vm938_vm3, %v927_v46, -1e+30  ;;  %v933_v3 = vsel %vm932_vm2, %v927_v46, 0.0 }
 0x158   :  { %940 = vmax.xlane.f32.xlu0 %v939_v58  ;;  %935 = vst [vmem:[%s1909_s5] sm:$0xff] %v933_v3 }
 0x1e5   :  { %v941_v63 = vpop.xlane.xlu0 %940 }
 0x1e6   :  { %v942_v12 = vsub.f32 %v939_v58, %v941_v63 }
 0x1e8   :  { %v943_v10 = vmul.f32 1.442695, %v942_v12 }
 0x1ea   :  { %1362 = vpow2.f32 %v943_v10 }
 0x1f4   :  { %v1363_v23 = vpop.eup %1362 }
 0x1f5   :  { %945 = vadd.xlane.f32.xlu0 %v1363_v23 }
 0x282   :  { %v946_v44 = vpop.xlane.xlu0 %945 }
 0x283   :  { %1364 = vlog2.f32 %v946_v44 }
 0x28d   :  { %v1365_v17 = vpop.eup %1364 }
 0x28e   :  { %v948_v42 = vmul.f32 0.6931472, %v1365_v17 }
 0x290   :  { %v949_v50 = vsub.f32 %v942_v12, %v948_v42 }
 0x292   :  { %950 = vst [vmem:[%s1910_s4] sm:$0xff] %v949_v50 }

</bundles_post_ra>
